<compile_context>
chip_gen: v6e
topology: v6e:2x2x1
jax: 0.10.0
libtpu: 0.0.40
codegen_flags: <defaults>
</compile_context>

<pallas_src>
import jax
import jax.numpy as jnp
from jax.experimental import pallas as pl
from jax.experimental.pallas import tpu as pltpu


def _round_up(v, m):
    return (v + m - 1) // m * m


def _sublane_align(*dtypes):
    """Native sublane multiple for the narrowest dtype involved (f32:8, bf16:16, 8-bit:32)."""
    return max(8 * (4 // jnp.dtype(d).itemsize) for d in dtypes)


def _tile(size, align, max_tile):
    """Return (tile, padded_size). tile is a multiple of `align`, <= max_tile, and
    divides padded_size; padded_size is only rounded up to `align` (no cap-sized
    over-padding)."""
    padded = _round_up(size, align)
    if padded <= max_tile:
        return padded, padded
    t = (max_tile // align) * align
    while t >= align:
        if padded % t == 0:
            return t, padded
        t -= align
    return align, padded  # unreachable with align | padded


def _kernel_single_k(x_ref, w_ref, shift_ref, o_ref):
    """K fits in one tile: matmul + folded bias/BN shift + ReLU, no scratch."""
    acc = jnp.dot(x_ref[...].astype(w_ref.dtype), w_ref[...],
                  preferred_element_type=jnp.float32)
    o_ref[...] = jnp.maximum(acc + shift_ref[...], 0.0).astype(o_ref.dtype)


def _kernel_multi_k(x_ref, w_ref, shift_ref, o_ref, acc_ref):
    """K tiled: f32 VMEM accumulator with pl.when init/finalize."""
    k = pl.program_id(2)

    @pl.when(k == 0)
    def _():
        acc_ref[...] = jnp.zeros_like(acc_ref)

    acc_ref[...] += jnp.dot(x_ref[...].astype(w_ref.dtype), w_ref[...],
                            preferred_element_type=jnp.float32)

    @pl.when(k == pl.num_programs(2) - 1)
    def _():
        y = acc_ref[...] + shift_ref[...]
        o_ref[...] = jnp.maximum(y, 0.0).astype(o_ref.dtype)


def fold_linear_bn_params(weight, bias, gamma, beta, running_mean, running_var,
                          eps=1e-5, compute_dtype=jnp.bfloat16,
                          max_tn=512, max_tk=2048):
    """One-time (parameter-load) fold of Linear bias + eval-mode BatchNorm1d.

    weight: [F_out, F_in] (PyTorch layout). Returns lane-aligned, pre-transposed,
    pre-padded operands plus tiling metadata.
    """
    f_out, f_in = weight.shape
    scale = gamma / jnp.sqrt(running_var + eps)                      # [F_out]
    w_folded = (weight * scale[:, None]).T.astype(compute_dtype)     # [F_in, F_out]
    shift = ((bias - running_mean) * scale + beta).astype(jnp.float32)

    tk, k_pad = _tile(f_in, 128, max_tk)
    tn, n_pad = _tile(f_out, 128, max_tn)

    w_p = w_folded
    if (k_pad, n_pad) != w_folded.shape:
        w_p = jnp.pad(w_folded, ((0, k_pad - f_in), (0, n_pad - f_out)))
    shift_p = jnp.pad(shift, (0, n_pad - f_out)).reshape(1, n_pad)
    return w_p, shift_p, (f_in, f_out, tk, tn)


def linear_block_apply(x, w_p, shift_p, dims, *, out_dtype=None, max_tm=512):
    """x: [B, F_in]; w_p/shift_p from fold_linear_bn_params. Returns [B, F_out]."""
    f_in, f_out, tk, tn = dims
    b, xf = x.shape
    assert xf == f_in, (xf, f_in)
    out_dtype = jnp.dtype(out_dtype if out_dtype is not None else x.dtype)
    k_pad, n_pad = w_p.shape

    # tm aligned to the native sublane tile of every dtype touching the block.
    align_m = _sublane_align(x.dtype, w_p.dtype, out_dtype)
    tm, m_pad = _tile(b, align_m, max_tm)

    # Pad only when actually required; x is cast to the weight dtype inside the
    # kernel, so no wrapper-side astype pass over the activations.
    x_p = x
    if (m_pad, k_pad) != x.shape:
        x_p = jnp.pad(x, ((0, m_pad - b), (0, k_pad - f_in)))

    grid_m, grid_n, grid_k = m_pad // tm, n_pad // tn, k_pad // tk

    # Advisory cost estimate for XLA's scheduler.
    flops = 2 * m_pad * n_pad * k_pad
    bytes_accessed = (m_pad * k_pad * x.dtype.itemsize * grid_n      # x streamed per N-tile
                      + k_pad * n_pad * w_p.dtype.itemsize * grid_m  # W streamed per M-tile
                      + n_pad * shift_p.dtype.itemsize * grid_m
                      + m_pad * n_pad * out_dtype.itemsize)
    cost = pl.CostEstimate(flops=flops, transcendentals=0,
                           bytes_accessed=bytes_accessed)

    # Double-buffered VMEM footprint estimate -> explicit scoped-VMEM limit
    # (v5e default is 16 MiB; keep the limit well under v7x's 64 MiB physical).
    vmem_est = 2 * (tm * tk * x.dtype.itemsize
                    + tk * tn * w_p.dtype.itemsize
                    + tm * tn * out_dtype.itemsize
                    + tn * shift_p.dtype.itemsize)
    if grid_k > 1:
        vmem_est += tm * tn * 4
    vmem_limit = min(max(int(vmem_est * 3 // 2) + (2 << 20), 32 << 20), 56 << 20)

    if grid_k == 1:
        out = pl.pallas_call(
            _kernel_single_k,
            out_shape=jax.ShapeDtypeStruct((m_pad, n_pad), out_dtype),
            grid=(grid_m, grid_n),
            in_specs=[
                pl.BlockSpec((tm, tk), lambda i, j: (i, 0)),   # x tile
                pl.BlockSpec((tk, tn), lambda i, j: (0, j)),   # folded weight tile
                pl.BlockSpec((1, tn), lambda i, j: (0, j)),    # folded shift
            ],
            out_specs=pl.BlockSpec((tm, tn), lambda i, j: (i, j)),
            compiler_params=pltpu.CompilerParams(
                dimension_semantics=("parallel", "parallel"),
                vmem_limit_bytes=vmem_limit),
            cost_estimate=cost,
        )(x_p, w_p, shift_p)
    else:
        out = pl.pallas_call(
            _kernel_multi_k,
            out_shape=jax.ShapeDtypeStruct((m_pad, n_pad), out_dtype),
            grid=(grid_m, grid_n, grid_k),
            in_specs=[
                pl.BlockSpec((tm, tk), lambda i, j, k: (i, k)),
                pl.BlockSpec((tk, tn), lambda i, j, k: (k, j)),
                pl.BlockSpec((1, tn), lambda i, j, k: (0, j)),
            ],
            out_specs=pl.BlockSpec((tm, tn), lambda i, j, k: (i, j)),
            scratch_shapes=[pltpu.VMEM((tm, tn), jnp.float32)],
            compiler_params=pltpu.CompilerParams(
                dimension_semantics=("parallel", "parallel", "arbitrary"),
                vmem_limit_bytes=vmem_limit),
            cost_estimate=cost,
        )(x_p, w_p, shift_p)

    if (m_pad, n_pad) != (b, f_out):
        out = out[:b, :f_out]
    return out


def linear_block(x, weight, bias, gamma, beta, running_mean, running_var,
                 eps=1e-5, compute_dtype=jnp.bfloat16, out_dtype=None,
                 max_tm=512, max_tn=512, max_tk=2048):
    """Convenience wrapper: fold params (normally done once at load time) then apply."""
    w_p, shift_p, dims = fold_linear_bn_params(
        weight, bias, gamma, beta, running_mean, running_var,
        eps=eps, compute_dtype=compute_dtype, max_tn=max_tn, max_tk=max_tk)
    return linear_block_apply(x, w_p, shift_p, dims,
                              out_dtype=out_dtype, max_tm=max_tm)


def _reference(x, weight, bias, gamma, beta, running_mean, running_var, eps=1e-5):
    """Pure-JAX eval-mode Linear + BatchNorm1d + ReLU (Dropout is identity)."""
    y = x @ weight.T + bias
    y = (y - running_mean) / jnp.sqrt(running_var + eps) * gamma + beta
    return jnp.maximum(y, 0.0)


def _make_params(key, f_in, f_out):
    kw, kb, kg, kbe, km, kv = jax.random.split(key, 6)
    weight = jax.random.normal(kw, (f_out, f_in), jnp.float32) * 0.1
    bias = jax.random.normal(kb, (f_out,), jnp.float32) * 0.1
    gamma = 1.0 + 0.1 * jax.random.normal(kg, (f_out,), jnp.float32)
    beta = 0.1 * jax.random.normal(kbe, (f_out,), jnp.float32)
    running_mean = 0.1 * jax.random.normal(km, (f_out,), jnp.float32)
    running_var = 1.0 + 0.1 * jax.random.uniform(kv, (f_out,), jnp.float32)
    return weight, bias, gamma, beta, running_mean, running_var


if __name__ == "__main__":
    # Shapes consistent with the module's forward: [batch, input_len] -> [batch, output_len].
    batch, input_len, output_len = 8, 32, 64
    dropout_rate = 0.1  # present in the module; identity in eval mode.

    key = jax.random.PRNGKey(0)
    kx, kp, kx2, kp2 = jax.random.split(key, 4)

    x = jax.random.normal(kx, (batch, input_len), dtype=jnp.float32)
    params = _make_params(kp, input_len, output_len)
    ref = _reference(x, *params)

    # Default path: bf16 folded weights, in-kernel cast, f32 accumulation/epilogue.
    out = linear_block(x, *params)
    out = jax.block_until_ready(out)
    assert out.shape == (batch, output_len)
    assert jnp.allclose(out, ref, atol=3e-2, rtol=3e-2)

    # f32 compute path: tight tolerance against the reference.
    out_f32 = linear_block(x, *params, compute_dtype=jnp.float32)
    out_f32 = jax.block_until_ready(out_f32)
    assert jnp.allclose(out_f32, ref, atol=1e-4, rtol=1e-4)

    # Multi-tile path (exercises M/N/K tiling, padding in M and N, and the
    # accumulator kernel) by shrinking the tile caps.
    b2, in2, out2 = 24, 256, 192
    x2 = jax.random.normal(kx2, (b2, in2), dtype=jnp.float32)
    params2 = _make_params(kp2, in2, out2)
    ref2 = _reference(x2, *params2)
    out2_arr = linear_block(x2, *params2, compute_dtype=jnp.float32,
                            max_tm=16, max_tn=128, max_tk=128)
    out2_arr = jax.block_until_ready(out2_arr)
    assert out2_arr.shape == (b2, out2)
    assert jnp.allclose(out2_arr, ref2, atol=1e-3, rtol=1e-3)

    print("KERNEL_OK")
</pallas_src>

<mosaic_0001>
module attributes {stable_mosaic.version = 11 : i64} {
  func.func @_kernel_single_k(%arg0: i32, %arg1: i32, %arg2: memref<16x128xf32, #tpu.memory_space<vmem>>, %arg3: memref<128x128xbf16, #tpu.memory_space<vmem>>, %arg4: memref<1x128xf32, #tpu.memory_space<vmem>>, %arg5: memref<16x128xf32, #tpu.memory_space<vmem>>) attributes {dimension_semantics = [#tpu.dimension_semantics<parallel>, #tpu.dimension_semantics<parallel>], iteration_bounds = array<i64: 1, 1>, scalar_prefetch = 0 : i64, scratch_operands = 0 : i64, tpu.core_type = #tpu.core_type<tc>, window_params = [{transform_indices = @transform_0, window_bounds = array<i64: 16, 128>}, {transform_indices = @transform_1, window_bounds = array<i64: 128, 128>}, {transform_indices = @transform_2, window_bounds = array<i64: 1, 128>}, {transform_indices = @transform_3, window_bounds = array<i64: 16, 128>}]} {
    %c0 = arith.constant 0 : index
    %c0_0 = arith.constant 0 : index
    %0 = vector.load %arg2[%c0, %c0_0] : memref<16x128xf32, #tpu.memory_space<vmem>>, vector<16x128xf32>
    %1 = arith.truncf %0 : vector<16x128xf32> to vector<16x128xbf16>
    %c0_1 = arith.constant 0 : index
    %c0_2 = arith.constant 0 : index
    %2 = vector.load %arg3[%c0_1, %c0_2] : memref<128x128xbf16, #tpu.memory_space<vmem>>, vector<128x128xbf16>
    %cst = arith.constant dense<0.000000e+00> : vector<16x128xf32>
    %3 = tpu.matmul %1, %2, %cst {dimension_numbers = #tpu.dot_dimension_numbers<[1], [0], [0], [1], [0, 0, 1, 1], [], []>} : vector<16x128xbf16>, vector<128x128xbf16>, vector<16x128xf32> -> vector<16x128xf32>
    %c0_3 = arith.constant 0 : index
    %c0_4 = arith.constant 0 : index
    %4 = vector.load %arg4[%c0_3, %c0_4] : memref<1x128xf32, #tpu.memory_space<vmem>>, vector<1x128xf32>
    %5 = vector.broadcast %4 : vector<1x128xf32> to vector<16x128xf32>
    %6 = arith.addf %3, %5 : vector<16x128xf32>
    %cst_5 = arith.constant 0.000000e+00 : f32
    %7 = vector.broadcast %cst_5 : f32 to vector<16x128xf32>
    %8 = arith.maximumf %6, %7 : vector<16x128xf32>
    %c0_6 = arith.constant 0 : index
    %c0_7 = arith.constant 0 : index
    %9 = vector.load %arg5[%c0_6, %c0_7] : memref<16x128xf32, #tpu.memory_space<vmem>>, vector<16x128xf32>
    tpu.vector_store %arg5[%c0_6, %c0_7], %8 {strides = array<i32>} : memref<16x128xf32, #tpu.memory_space<vmem>>, vector<16x128xf32>,
    return
  }
  func.func @transform_0(%arg0: i32, %arg1: i32) -> (i32, i32) {
    %c0_i32 = arith.constant 0 : i32
    %c0_i32_0 = arith.constant 0 : i32
    return %arg0, %c0_i32 : i32, i32
  }
  func.func @transform_1(%arg0: i32, %arg1: i32) -> (i32, i32) {
    %c0_i32 = arith.constant 0 : i32
    %c0_i32_0 = arith.constant 0 : i32
    return %c0_i32, %arg1 : i32, i32
  }
  func.func @transform_2(%arg0: i32, %arg1: i32) -> (i32, i32) {
    %c0_i32 = arith.constant 0 : i32
    %c0_i32_0 = arith.constant 0 : i32
    return %c0_i32, %arg1 : i32, i32
  }
  func.func @transform_3(%arg0: i32, %arg1: i32) -> (i32, i32) {
    %c0_i32 = arith.constant 0 : i32
    return %arg0, %arg1 : i32, i32
  }
}

</mosaic_0001>

<bundles_post_ra>
// kernel: tpu_custom_call.1
= control target key start
LH: loop header
LB: loop body
LE: loop exit
PB: predicated region body
PF: predicated region fallthrough
CT: control target
= control target key end

     0   :  { %8 = vsyncpa [#allocation3], 0  ;;  %s349_s0 = inlined_call_operand.hbm [shape: f32[16,128], index: 0, kind: input, shape index: {}]   ;;  %s350_s1 = inlined_call_operand.hbm [shape: bf16[128,128], index: 1, kind: input, shape index: {}]   ;;  %s351_s2 = inlined_call_operand.vmem [shape: f32[1,128], index: 2, kind: input, shape index: {}]   ;;  %s352_s3 = inlined_call_operand.hbm [shape: f32[16,128], index: 3, kind: output, shape index: {}]  }
   0x1   :  { %9 = vsyncpa [#allocation6], 0 }
   0x2   :  { %10 = vsyncpa [#allocation4], 0  ;;  %s302_s12 = smov [#allocation2]  }
   0x3   :  { %s16_s13 = sshll.u32 %s302_s12, 4  ;;  %s17_s13 = int_to_ptr.vmem [resolvable:$true] %s16_s13 }
   0x4   :  { %s244_s14 = scalar_lea.vmem %s17_s13, 256  ;;  %p249_p1 = scmp.lt.s32.totalorder %s17_s13, %s17_s13 }
   0x5   :  { %p245_p0 = scmp.ne.s32.totalorder %s17_s13, %s244_s14  ;;  %p250_p2 = scmp.lt.s32.totalorder %s244_s14, %s244_s14 }
   0x7   :  { %p251_p3 = por %p250_p2, %p249_p1 }
   0x9   :  { %p252_p4 = pnand %p251_p3, %p245_p0 }
   0xb   :  { %255 = shalt.err (!%p252_p4)
}
   0xc   :  { %s303_s15 = smov 128   ;;  %s304_s16 = smov 8  }
   0xd   :  { %22 = dma.hbm_to_vmem [thread:$0]  %s349_s0, 256, %s17_s13, [#allocation3], %s303_s15, %s303_s15, %s304_s16  }
   0xe   :  { %s305_s19 = smov [#allocation5]  }
   0xf   :  { %s28_s20 = sshll.u32 %s305_s19, 4  ;;  %s29_s20 = int_to_ptr.vmem [resolvable:$true] %s28_s20 }
  0x10   :  { %s264_s21 = scalar_lea.vmem %s29_s20, 1024  ;;  %p269_p6 = scmp.lt.s32.totalorder %s29_s20, %s29_s20 }
  0x11   :  { %p265_p5 = scmp.ne.s32.totalorder %s29_s20, %s264_s21  ;;  %p270_p7 = scmp.lt.s32.totalorder %s264_s21, %s264_s21 }
  0x13   :  { %p271_p8 = por %p270_p7, %p269_p6 }
  0x15   :  { %p272_p9 = pnand %p271_p8, %p265_p5 }
  0x17   :  { %275 = shalt.err (!%p272_p9)
}
  0x18   :  { %s306_s22 = smov 64   ;;  %s307_s23 = smov 4  }
  0x19   :  { %34 = dma.hbm_to_vmem [thread:$0]  %s350_s1, 1024, %s29_s20, [#allocation6], %s306_s22, %s306_s22, %s307_s23  }
  0x1a   :  { %296 = dma.done.wait [#allocation3], 256  }
  0x1b   :  { %297 = vsyncadd [#allocation3], 4294967040 }
  0x1c   :  { %298 = dma.done.wait [#allocation6], 1024  }
  0x1d   :  { %299 = vsyncadd [#allocation6], 4294966272  ;;  %v308_v0 = vmov 0.0   ;;  %vm309_vm0 = vmmov 0   ;;  %v228_v1 = vld [vmem:[#allocation5 + $0x38] sm:$0xff]   ;;  %v229_v2 = vld [vmem:[#allocation5 + $0x30] sm:$0xff]  }
  0x1e   :  { %199 = vmatprep.subr.bf16.mxu0 %v308_v0  ;;  %215 = vmatprep.mubr.msk.bf16.mxu0 %vm309_vm0, %v308_v0  ;;  %v230_v3 = vld [vmem:[#allocation5 + $0x28] sm:$0xff]   ;;  %v231_v4 = vld [vmem:[#allocation5 + $0x20] sm:$0xff]   ;;  %v232_v5 = vld [vmem:[#allocation5 + $0x18] sm:$0xff]   ;;  %s310_s26 = smov [#allocation7]  }
  0x1f   :  { %200 = vmatpush3.bf16.msra.mxu0 %v228_v1  ;;  %v233_v6 = vld [vmem:[#allocation5 + $0x10] sm:$0xff]   ;;  %v234_v7 = vld [vmem:[#allocation5 + $0x8] sm:$0xff]   ;;  %v235_v8 = vld [vmem:[#allocation5] sm:$0xff]   ;;  %s168_s27 = sshll.u32 %s310_s26, 4  ;;  %s169_s27 = int_to_ptr.vmem [resolvable:$true] %s168_s27 }
  0x20   :  { %201 = vmatprep.subr.bf16.mxu0 %v308_v0  ;;  %v44_v9 = vld [vmem:[#allocation2] sm:$0xff]  ;;  %v45_v10 = vld [vmem:[#allocation2 + $0x8] sm:$0xff]  ;;  %s276_s28 = scalar_lea.vmem %s169_s27, 256  ;;  %p281_p11 = scmp.lt.s32.totalorder %s169_s27, %s169_s27 }
  0x21   :  { %v46_v11 = vpack.c.bf16 %v45_v10, %v44_v9  ;;  %v181_v12 = vld [vmem:[%s351_s2] ss:$0 sm:$0xff]  ;;  %p277_p10 = scmp.ne.s32.totalorder %s169_s27, %s276_s28  ;;  %p282_p12 = scmp.lt.s32.totalorder %s276_s28, %s276_s28 }
  0x23   :  { %202 = vmatpush3.bf16.msra.mxu0 %v229_v2  ;;  %p283_p13 = por %p282_p12, %p281_p11 }
  0x24   :  { %203 = vmatprep.subr.bf16.mxu0 %v308_v0 }
  0x25   :  { %p284_p0 = pnand %p283_p13, %p277_p10 }
  0x27   :  { %204 = vmatpush3.bf16.msra.mxu0 %v230_v3 }
  0x28   :  { %205 = vmatprep.subr.bf16.mxu0 %v308_v0 }
  0x2b   :  { %206 = vmatpush3.bf16.msra.mxu0 %v231_v4 }
  0x2c   :  { %207 = vmatprep.subr.bf16.mxu0 %v308_v0 }
  0x2f   :  { %208 = vmatpush3.bf16.msra.mxu0 %v232_v5 }
  0x30   :  { %209 = vmatprep.subr.bf16.mxu0 %v308_v0 }
  0x33   :  { %210 = vmatpush3.bf16.msra.mxu0 %v233_v6 }
  0x34   :  { %211 = vmatprep.subr.bf16.mxu0 %v308_v0 }
  0x37   :  { %212 = vmatpush3.bf16.msra.mxu0 %v234_v7 }
  0x38   :  { %213 = vmatprep.subr.bf16.mxu0 %v308_v0 }
  0x3b   :  { %214 = vmatpush3.bf16.msra.mxu0 %v235_v8 }
  0x3e   :  { %216 = vmatmul.mubr.bf16.vlgmr.msra.gmra.mxu0 %v46_v11 }
  0xfe   :  { %v152_v13 = vpop.f32.mrf.mxu0 }
  0xff   :  { %v153_v14 = vadd.f32 %v181_v12, %v152_v13 }
 0x100   :  { %v217_v15 = vpop.f32.mrf.mxu0 }
 0x101   :  { %v159_v16 = vmax.f32 %v153_v14, 0.0 }
 0x102   :  { %v155_v17 = vpop.f32.mrf.mxu0 }
 0x103   :  { %161 = vst [vmem:[#allocation7] sm:$0xff] %v159_v16  ;;  %v156_v18 = vadd.f32 %v181_v12, %v155_v17 }
 0x104   :  { %v218_v19 = vpop.f32.mrf.mxu0 }
 0x105   :  { %v160_v20 = vmax.f32 %v156_v18, 0.0 }
 0x107   :  { %162 = vst [vmem:[#allocation7 + $0x8] sm:$0xff] %v160_v20 }
 0x108   :  { %287 = shalt.err (!%p284_p0)
}
 0x109   :  { %174 = dma.vmem_to_hbm [thread:$0]  %s169_s27, 256, %s352_s3, [#allocation4], %s303_s15, %s303_s15, %s304_s16  }
 0x10a   :  { %300 = dma.done.wait [#allocation4], 256  }
 0x10b   :  { %301 = vsyncadd [#allocation4], 4294967040 }
 0x10c   :  { %178 = vsyncpa [#allocation3], 1 }
 0x10d   :  { %179 = vsyncpa [#allocation6], 1 }
 0x10e   :  { %180 = vsyncpa [#allocation4], 1 }

</bundles_post_ra>
